<compile_context>
chip_gen: v6e
topology: v6e:2x2x1
jax: 0.10.0
libtpu: 0.0.40
codegen_flags: <defaults>
</compile_context>

<pallas_src>
import math

import jax
import jax.numpy as jnp
from jax.experimental import pallas as pl
from jax.experimental.pallas import tpu as pltpu


def _data_embedding_kernel(xp_ref, w_ref, pe_ref, o_ref):
    # Single fused matmul on the MXU:
    #   [x[t-1] | x[t] | x[t+1] | x_mark] @ [w0; w1; w2; W_time]
    acc = jnp.dot(xp_ref[0], w_ref[...], preferred_element_type=jnp.float32)
    # PositionalEmbedding add (f32) + final cast/store.
    o_ref[0] = (acc + pe_ref[...]).astype(o_ref.dtype)


def data_embedding(x, x_mark, conv_w, lin_w, pe, *,
                   compute_dtype=jnp.float32, out_dtype=jnp.float32, tl=512):
    """DataEmbedding forward.

    x:      (B, L, c_in)     value series
    x_mark: (B, L, d_inp)    time features
    conv_w: (d_model, c_in, 3)  circular conv1d weight (PyTorch NCW layout)
    lin_w:  (d_inp, d_model)    time-feature linear weight (already transposed)
    pe:     (L, d_model)        positional table (sin/cos)
    -> (B, L, d_model)
    """
    B, L, c_in = x.shape
    d_inp = x_mark.shape[-1]
    d_model = conv_w.shape[0]
    K = 3 * c_in + d_inp

    # Fold the circular k=3 conv + linear into one packed (K, d_model) weight.
    w_packed = jnp.concatenate(
        [conv_w[:, :, 0].T, conv_w[:, :, 1].T, conv_w[:, :, 2].T, lin_w],
        axis=0).astype(compute_dtype)

    # Pack [x[t-1], x[t], x[t+1], x_mark] along the feature axis.  XLA fuses
    # the circular rolls into this single narrow (K-wide) concat write; it
    # also makes every output row depend only on its own packed row, so the
    # kernel can tile L freely (no halo / no cross-tile wrap).
    x_packed = jnp.concatenate(
        [jnp.roll(x, 1, axis=1), x, jnp.roll(x, -1, axis=1), x_mark],
        axis=-1).astype(compute_dtype)

    pe = pe.astype(jnp.float32)

    # Row tiling: full L if it is small, otherwise 512-row lane-dense tiles
    # (keeps VMEM flat and amortizes per-step grid overhead).
    TL = L if L <= tl else tl
    n_l = pl.cdiv(L, TL)

    return pl.pallas_call(
        _data_embedding_kernel,
        out_shape=jax.ShapeDtypeStruct((B, L, d_model), out_dtype),
        grid_spec=pltpu.PrefetchScalarGridSpec(
            num_scalar_prefetch=0,
            grid=(B, n_l),
            in_specs=[
                # packed activations, tiled over (batch, L-tile)
                pl.BlockSpec((1, TL, K), lambda b, l: (b, l, 0)),
                # packed weight: constant index -> fetched into VMEM once
                pl.BlockSpec((K, d_model), lambda b, l: (0, 0)),
                # positional table, tiled over L only
                pl.BlockSpec((TL, d_model), lambda b, l: (l, 0)),
            ],
            out_specs=pl.BlockSpec((1, TL, d_model), lambda b, l: (b, l, 0)),
        ),
        compiler_params=pltpu.CompilerParams(
            dimension_semantics=("parallel", "parallel")),
    )(x_packed, w_packed, pe)


def make_positional_embedding(L, d_model):
    position = jnp.arange(L, dtype=jnp.float32)[:, None]
    div_term = jnp.exp(
        jnp.arange(0, d_model, 2, dtype=jnp.float32)
        * -(math.log(10000.0) / d_model))
    pe = jnp.zeros((L, d_model), jnp.float32)
    pe = pe.at[:, 0::2].set(jnp.sin(position * div_term))
    pe = pe.at[:, 1::2].set(jnp.cos(position * div_term))
    return pe


def reference(x, x_mark, conv_w, lin_w, pe):
    x_prev = jnp.roll(x, 1, axis=1)
    x_next = jnp.roll(x, -1, axis=1)
    val = (x_prev @ conv_w[:, :, 0].T + x @ conv_w[:, :, 1].T
           + x_next @ conv_w[:, :, 2].T)
    return val + x_mark @ lin_w + pe[None]


def _make_params(key, c_in, d_model, d_inp):
    k3, k4 = jax.random.split(key)
    # Conv1d weight (d_model, c_in, 3), kaiming_normal_(fan_in, leaky_relu)
    fan_in = c_in * 3
    gain = math.sqrt(2.0 / (1.0 + 0.01 ** 2))
    conv_w = jax.random.normal(k3, (d_model, c_in, 3), jnp.float32) * (
        gain / math.sqrt(fan_in))
    # Linear(d_inp, d_model, bias=False): U(-1/sqrt(d_inp), 1/sqrt(d_inp))
    bound = 1.0 / math.sqrt(d_inp)
    lin_w = jax.random.uniform(k4, (d_inp, d_model), jnp.float32,
                               minval=-bound, maxval=bound)
    return conv_w, lin_w


if __name__ == "__main__":
    B, L, c_in, d_model = 2, 8, 4, 32
    d_inp = 4  # freq='h'

    key = jax.random.PRNGKey(0)
    k1, k2, kp = jax.random.split(key, 3)

    x = jax.random.normal(k1, (B, L, c_in), jnp.float32)
    x_mark = jax.random.normal(k2, (B, L, d_inp), jnp.float32)
    conv_w, lin_w = _make_params(kp, c_in, d_model, d_inp)
    pe = make_positional_embedding(L, d_model)

    ref = reference(x, x_mark, conv_w, lin_w, pe)

    # 1) f32 path (bit-faithful to the PyTorch module's numerics)
    out = data_embedding(x, x_mark, conv_w, lin_w, pe)
    out = jax.block_until_ready(out)
    assert out.shape == (B, L, d_model)
    assert jnp.allclose(out, ref, atol=1e-5, rtol=1e-5)

    # 2) bf16-operand path (f32 accumulation) — looser tolerance
    out_bf = data_embedding(x, x_mark, conv_w, lin_w, pe,
                            compute_dtype=jnp.bfloat16)
    out_bf = jax.block_until_ready(out_bf)
    assert jnp.allclose(out_bf, ref, atol=5e-2, rtol=5e-2)

    # 3) multi-L-tile path (tile does not divide L -> masked edge block)
    L2 = 24
    k5, k6 = jax.random.split(jax.random.PRNGKey(1))
    x2 = jax.random.normal(k5, (B, L2, c_in), jnp.float32)
    xm2 = jax.random.normal(k6, (B, L2, d_inp), jnp.float32)
    pe2 = make_positional_embedding(L2, d_model)
    out2 = data_embedding(x2, xm2, conv_w, lin_w, pe2, tl=16)
    out2 = jax.block_until_ready(out2)
    assert jnp.allclose(out2, reference(x2, xm2, conv_w, lin_w, pe2),
                        atol=1e-5, rtol=1e-5)

    print("KERNEL_OK")
</pallas_src>

<mosaic_0001>
module attributes {stable_mosaic.version = 11 : i64} {
  func.func @_data_embedding_kernel(%arg0: i32, %arg1: i32, %arg2: memref<1x8x16xf32, #tpu.memory_space<vmem>>, %arg3: memref<16x32xf32, #tpu.memory_space<vmem>>, %arg4: memref<8x32xf32, #tpu.memory_space<vmem>>, %arg5: memref<1x8x32xf32, #tpu.memory_space<vmem>>) attributes {dimension_semantics = [#tpu.dimension_semantics<parallel>, #tpu.dimension_semantics<parallel>], iteration_bounds = array<i64: 2, 1>, scalar_prefetch = 0 : i64, scratch_operands = 0 : i64, tpu.core_type = #tpu.core_type<tc>, window_params = [{transform_indices = @transform_0, window_bounds = array<i64: 1, 8, 16>}, {pipeline_mode = #tpu.pipeline_mode<synchronous>, transform_indices = @transform_1, window_bounds = array<i64: 16, 32>}, {transform_indices = @transform_2, window_bounds = array<i64: 8, 32>}, {transform_indices = @transform_3, window_bounds = array<i64: 1, 8, 32>}]} {
    %c0 = arith.constant 0 : index
    %c0_0 = arith.constant 0 : index
    %c0_1 = arith.constant 0 : index
    %0 = vector.load %arg2[%c0, %c0_0, %c0_1] : memref<1x8x16xf32, #tpu.memory_space<vmem>>, vector<1x8x16xf32>
    %1 = vector.shape_cast %0 : vector<1x8x16xf32> to vector<8x16xf32>
    %c0_2 = arith.constant 0 : index
    %c0_3 = arith.constant 0 : index
    %2 = vector.load %arg3[%c0_2, %c0_3] : memref<16x32xf32, #tpu.memory_space<vmem>>, vector<16x32xf32>
    %cst = arith.constant dense<0.000000e+00> : vector<8x32xf32>
    %3 = tpu.matmul %1, %2, %cst {dimension_numbers = #tpu.dot_dimension_numbers<[1], [0], [0], [1], [0, 0, 1, 1], [], []>} : vector<8x16xf32>, vector<16x32xf32>, vector<8x32xf32> -> vector<8x32xf32>
    %c0_4 = arith.constant 0 : index
    %c0_5 = arith.constant 0 : index
    %4 = vector.load %arg4[%c0_4, %c0_5] : memref<8x32xf32, #tpu.memory_space<vmem>>, vector<8x32xf32>
    %5 = arith.addf %3, %4 : vector<8x32xf32>
    %c0_6 = arith.constant 0 : index
    %c0_7 = arith.constant 0 : index
    %c0_8 = arith.constant 0 : index
    %6 = vector.load %arg5[%c0_6, %c0_7, %c0_8] : memref<1x8x32xf32, #tpu.memory_space<vmem>>, vector<1x8x32xf32>
    %7 = vector.shape_cast %6 : vector<1x8x32xf32> to vector<8x32xf32>
    %8 = vector.shape_cast %5 : vector<8x32xf32> to vector<1x8x32xf32>
    tpu.vector_store %arg5[%c0_6, %c0_7, %c0_8], %8 {strides = array<i32>} : memref<1x8x32xf32, #tpu.memory_space<vmem>>, vector<1x8x32xf32>,
    return
  }
  func.func @transform_0(%arg0: i32, %arg1: i32) -> (i32, i32, i32) {
    %c0_i32 = arith.constant 0 : i32
    %c0_i32_0 = arith.constant 0 : i32
    return %arg0, %arg1, %c0_i32 : i32, i32, i32
  }
  func.func @transform_1(%arg0: i32, %arg1: i32) -> (i32, i32) {
    %c0_i32 = arith.constant 0 : i32
    %c0_i32_0 = arith.constant 0 : i32
    %c0_i32_1 = arith.constant 0 : i32
    return %c0_i32, %c0_i32_0 : i32, i32
  }
  func.func @transform_2(%arg0: i32, %arg1: i32) -> (i32, i32) {
    %c0_i32 = arith.constant 0 : i32
    %c0_i32_0 = arith.constant 0 : i32
    return %arg1, %c0_i32 : i32, i32
  }
  func.func @transform_3(%arg0: i32, %arg1: i32) -> (i32, i32, i32) {
    %c0_i32 = arith.constant 0 : i32
    %c0_i32_0 = arith.constant 0 : i32
    return %arg0, %arg1, %c0_i32 : i32, i32, i32
  }
}

</mosaic_0001>

<bundles_post_ra>
// kernel: tpu_custom_call.1
= control target key start
LH: loop header
LB: loop body
LE: loop exit
PB: predicated region body
PF: predicated region fallthrough
CT: control target
= control target key end

     0   :  { %8 = vsyncpa [#allocation3], 0  ;;  %s922_s0 = inlined_call_operand.hbm [shape: f32[2,8,16], index: 0, kind: input, shape index: {}]   ;;  %s923_s1 = inlined_call_operand.hbm [shape: f32[16,32], index: 1, kind: input, shape index: {}]   ;;  %s924_s2 = inlined_call_operand.hbm [shape: f32[8,32], index: 2, kind: input, shape index: {}]   ;;  %s925_s3 = inlined_call_operand.hbm [shape: f32[2,8,32], index: 3, kind: output, shape index: {}]  }
   0x1   :  { %10 = vsyncpa [#allocation3 + $0x1], 0 }
   0x2   :  { %11 = vsyncpa [#allocation6], 0 }
   0x3   :  { %12 = vsyncpa [#allocation4], 0 }
   0x4   :  { %14 = vsyncpa [#allocation4 + $0x1], 0  ;;  %s742_s12 = smov 0   ;;  %s744_s13 = smov 0  }
   0x5   :  { %s746_s14 = smov 0   ;;  %s748_s15 = smov 0  }
   0x6   :  { %s750_s16 = smov 0   ;;  %s752_s17 = smov 0  }
   0x7 LB: > { %s433_s18 = sadd.s32 4294967295, %s712_s17   ;;  %s434_s19 = sadd.s32 4294967294, %s712_s17   ;;  %s712_s17 = sphi %s752_s17, %s20_s17   ;;  %s708_s16 = sphi %s750_s16, %s945_s16   ;;  %s704_s15 = sphi %s748_s15, %s944_s15   ;;  %s700_s14 = sphi %s746_s14, %s943_s14   ;;  %s696_s13 = sphi %s744_s13, %s942_s13   ;;  %s692_s12 = sphi %s742_s12, %s941_s12  }
   0x8   : > { %p54_p0 = scmp.ne.s32.totalorder %s696_s13, %s692_s12  ;;  %p776_p1 = scmp.eq.s32.totalorder %s433_s18, 0 }
   0x9   : > { %p780_p2 = scmp.eq.s32.totalorder %s433_s18, 1  ;;  %p133_p3 = scmp.eq.s32.totalorder %s434_s19, 1 }
   0xa   : > { %s929_s20 = scalar_select %p776_p1, 1, 0 }
   0xb   : > { %p786_p4 = por %p776_p1, %p54_p0  ;;  %p435_p5 = scmp.ge.s32.totalorder %s712_s17, 1 }
   0xc   : > { %p791_p6 = por %p133_p3, %p54_p0  ;;  %p140_p7 = scmp.lt.s32.totalorder %s712_s17, 3 }
   0xd   : > { %s931_s22 = scalar_select %p786_p4, 1, 0 }
   0xe   : > { %s932_s23 = scalar_select %p791_p6, 1, 0 }
   0xf   : > { %p796_p8 = pnand %p435_p5, %p140_p7  ;;  %s714_s25 = smov [#allocation5]  }
  0x10   : > { %s152_s26 = sshll.u32 %s714_s25, 4  ;;  %s715_s28 = smov [#allocation7]   ;;  %s153_s26 = int_to_ptr.vmem [resolvable:$true] %s152_s26 }
  0x11   : > { %p473_p9 = pneg %p796_p8  ;;  %s168_s29 = sshll.u32 %s715_s28, 4  ;;  %s169_s29 = int_to_ptr.vmem [resolvable:$true] %s168_s29 }
  0x12   : > { %s559_s30 = scalar_lea.vmem %s153_s26, 256  ;;  %p567_p5 = scmp.lt.s32.totalorder %s153_s26, %s153_s26 }
  0x13   : > { %p805_p11 = pnand %p473_p9, %p776_p1  ;;  %p560_p13 = scmp.ne.s32.totalorder %s153_s26, %s559_s30 }
  0x14   : > { %p568_p7 = scmp.lt.s32.totalorder %s559_s30, %s559_s30 }
  0x15   : > { %p550_p12 = pneg %p805_p11 }
  0x16   : > { %p569_p10 = por %p568_p7, %p567_p5 }
  0x17   : > { %p562_p0 = pnand %p560_p13, %p550_p12 }
  0x19   : > { %p563_p3 = pneg %p562_p0 }
  0x1b   : > { %p570_p9 = pnand %p569_p10, %p563_p3 }
  0x1d   : > { %573 = shalt.err (!%p570_p9)
}
  0x1e   : > { %s716_s4 = smov 128   ;;  %s717_s5 = smov 8  }
  0x1f   : > { %476 = dma.hbm_to_vmem [thread:$0]  (!%p805_p11), %s923_s1, 256, %s153_s26, [#allocation6], %s716_s4, %s716_s4, %s717_s5  }
  0x20   : > { %s585_s8 = scalar_lea.vmem %s169_s29, 128  ;;  %p593_p1 = scmp.lt.s32.totalorder %s169_s29, %s169_s29 }
  0x21   : > { %p586_p6 = scmp.ne.s32.totalorder %s169_s29, %s585_s8  ;;  %p594_p4 = scmp.lt.s32.totalorder %s585_s8, %s585_s8 }
  0x23   : > { %p588_p13 = pnand %p586_p6, %p550_p12  ;;  %p595_p5 = por %p594_p4, %p593_p1 }
  0x25   : > { %p589_p0 = pneg %p588_p13 }
  0x27   : > { %p596_p10 = pnand %p595_p5, %p589_p0 }
  0x29   : > { %599 = shalt.err (!%p596_p10)
}
  0x2a   : > { %479 = dma.hbm_to_vmem [thread:$0]  (!%p805_p11), %s924_s2, 128, %s169_s29, [#allocation6]  }
  0x2b   : > { %s32_s11 = sadd.s32 1, %s708_s16  ;;  %s41_s18 = sadd.s32 1, %s700_s14 }
  0x2c   : > { %p34_p1 = scmp.ge.s32.totalorder %s32_s11, 2  ;;  %p48_p4 = scmp.ne.s32.totalorder %s700_s14, %s696_s13 }
  0x2d   : > { %p49_p6 = scmp.eq.s32.totalorder %s712_s17, 0  ;;  %p490_p12 = scmp.lt.s32.totalorder %s712_s17, 2 }
  0x2e   : > { %s947_s11 = smov (%p34_p1, %s32_s11), 0  ;;  %p837_p7 = por %p780_p2, %p48_p4 }
  0x2f   : > { %p50_p3 = por %p49_p6, %p48_p4  ;;  %s36_s25 = ssub.s32 %s708_s16, %s947_s11 }
  0x30   : > { %s179_s26 = sand.u32 1, %s700_s14   ;;  %p39_p9 = scmp.eq.s32.totalorder %s36_s25, 0 }
  0x31   : > { %s439_s27 = sshll.u32 %s179_s26, 3  ;;  %s440_s28 = sshll.u32 %s708_s16, 7 }
  0x32   : > { %s846_s29 = scalar_select %p39_p9, %s700_s14, %s41_s18  }
  0x33   : > { %s189_s5 = scalar_lea.hbm %s922_s0, %s440_s28  ;;  %s183_s6 = scalar_lea.vmem [#allocation2], %s439_s27 }
  0x34   : > { %s191_s7 = sshll.u32 %s183_s6, 4  ;;  %p853_p11 = pnand %p490_p12, %p50_p3  ;;  %s192_s7 = int_to_ptr.vmem [resolvable:$true] %s191_s7 }
  0x35   : > { %s180_s8 = scalar_lea.sflag [#allocation3], %s179_s26  ;;  %s613_s9 = scalar_lea.vmem %s192_s7, 128 }
  0x36   : > { %p602_p2 = pneg %p853_p11  ;;  %p614_p13 = scmp.ne.s32.totalorder %s192_s7, %s613_s9 }
  0x37   : > { %s718_s10 = smov [#allocation2]  }
  0x38   : > { %p616_p0 = pnand %p614_p13, %p602_p2  ;;  %s618_s18 = sshll.u32 %s718_s10, 4  ;;  %s619_s18 = int_to_ptr.vmem [resolvable:$false] %s618_s18 }
  0x39   : > { %s620_s25 = scalar_lea.vmem %s619_s18, 256  ;;  %p621_p10 = scmp.lt.s32.totalorder %s192_s7, %s619_s18 }
  0x3a   : > { %p617_p5 = pneg %p616_p0  ;;  %p622_p1 = scmp.lt.s32.totalorder %s620_s25, %s613_s9 }
  0x3c   : > { %p623_p4 = por %p622_p1, %p621_p10 }
  0x3e   : > { %p624_p6 = pnand %p623_p4, %p617_p5 }
  0x40   : > { %627 = shalt.err (!%p624_p6)
}
  0x41   : > { %483 = dma.hbm_to_vmem [thread:$0]  (!%p853_p11), %s189_s5, 128, %s192_s7, %s180_s8  }
  0x42   : > { %200 = sbr.rel (%p796_p8) target bundleno = 288 (0x120), region = 32  ;;  %s864_s26 = sand.u32 (!%p796_p8), 1, %s696_s13  }
  0x43   : > { %s442_s27 = sshll.u32 (!%p796_p8), %s864_s26, 3  ;;  %s203_s28 = scalar_lea.sflag (!%p796_p8), [#allocation3], %s864_s26 }
  0x44   : > { %s206_s30 = scalar_lea.vmem (!%p796_p8), [#allocation2], %s442_s27  ;;  %p937_p12 = scmp.ne.s32.totalorder (!%p796_p8), %s931_s22, 0 }
  0x47   : > { %679 = dma.done.wait (%p937_p12), %s203_s28, 128  }
  0x48   : > { %681 = vsyncadd (%p937_p12), %s203_s28, 4294967168  ;;  %p938_p3 = scmp.ne.s32.totalorder %s929_s20, 0 }
  0x4a   : > { %683 = dma.done.wait (%p938_p3), [#allocation6], 384  }
  0x4b   : > { %685 = vsyncadd (%p938_p3), [#allocation6], 4294966912  ;;  %v719_v0 = vmov 0.0   ;;  %vm720_vm0 = vmmov 0   ;;  %v239_v1 = vld [vmem:[#allocation5 + $0x8] sm:$0xff]  ;;  %v238_v2 = vld [vmem:[#allocation5] sm:$0xff] }
  0x4c   : > { %454 = vmatprep.subr.mxu0 %v719_v0  ;;  %458 = vmatprep.mubr.msk.f32.mxu0 %vm720_vm0, %v719_v0  ;;  %v237_v3 = vld [vmem:[%s206_s30] sm:$0xff]  ;;  %vm241_vm1 = vcmask 130048   ;;  %s448_s22 = sshll.u32 %s704_s15, 7  ;;  %s236_s24 = scalar_lea.vmem [#allocation8], %s442_s27  ;;  %vm315_vm2 = vcmask 261120  }
  0x4d   : > { %455 = vmatpush3.msra.mxu0 %v239_v1  ;;  %v240_v4 = vld [vmem:[#allocation7] sm:$0xff]  ;;  %s332_s20 = sshll.u32 %s236_s24, 4  ;;  %s880_s6 = scalar_lea.hbm %s925_s3, %s448_s22  ;;  %s333_s20 = int_to_ptr.vmem [resolvable:$true] %s332_s20 }
  0x4e   : > { %456 = vmatprep.subr.mxu0 %v719_v0  ;;  %s318_s7 = scalar_lea.sflag [#allocation4], %s864_s26  ;;  %s628_s21 = scalar_lea.vmem %s333_s20, 128 }
  0x4f   : > { %457 = vmatpush3.msra.mxu0 %v238_v2  ;;  %p629_p8 = scmp.ne.s32.totalorder %s333_s20, %s628_s21  ;;  %s721_s15 = smov [#allocation8]  }
  0x50   : > { %459 = vmatmul.mubr.msk.f32.vlgmr.msra.gmra.mxu0 %vm241_vm1, %v237_v3  ;;  %s632_s8 = sshll.u32 %s721_s15, 4  ;;  %s633_s8 = int_to_ptr.vmem [resolvable:$false] %s632_s8 }
  0x51   : > { %p630_p9 = pnand %p629_p8, %p837_p7  ;;  %s634_s9 = scalar_lea.vmem %s633_s8, 256 }
  0x52   : > { %p635_p2 = scmp.lt.s32.totalorder %s333_s20, %s633_s8  ;;  %p636_p13 = scmp.lt.s32.totalorder %s634_s9, %s628_s21 }
  0x53   : > { %p631_p11 = pneg %p630_p9 }
  0x54   : > { %p637_p0 = por %p636_p13, %p635_p2 }
  0x56   : > { %p638_p5 = pnand %p637_p0, %p631_p11 }
 0x110   : > { %v311_v5 = vpop.f32.mrf.mxu0 }
 0x111   : > { %v312_v6 = vadd.f32 %v311_v5, %v240_v4 }
 0x112   : > { %v460_v7 = vpop.f32.mrf.mxu0 }
 0x113   : > { %316 = vst.msk [vmem:[%s236_s24] sm:$0xff] %vm315_vm2, %v312_v6 }
 0x114   : > { %641 = shalt.err (!%p638_p5)
}
 0x115   : > { %s642_s10 = scalar_lea.hbm %s880_s6, 128  ;;  %s646_s26 = scalar_lea.hbm %s925_s3, 256 }
 0x116   : > { %p643_p10 = scmp.ne.s32.totalorder %s880_s6, %s642_s10  ;;  %p647_p6 = scmp.lt.s32.totalorder %s880_s6, %s925_s3 }
 0x117   : > { %p648_p12 = scmp.lt.s32.totalorder %s646_s26, %s642_s10 }
 0x118   : > { %p644_p1 = pnand %p643_p10, %p837_p7 }
 0x119   : > { %p649_p3 = por %p648_p12, %p647_p6 }
 0x11a   : > { %p645_p4 = pneg %p644_p1 }
 0x11c   : > { %p650_p8 = pnand %p649_p3, %p645_p4 }
 0x11e   : > { %653 = shalt.err (!%p650_p8)
}
 0x11f   : > { %471 = dma.vmem_to_hbm [thread:$0]  (%p837_p7), %s333_s20, 128, %s880_s6, %s318_s7  }
 0x120 PF: > { %s344_s30 = sand.u32 1, %s692_s12   ;;  %p939_p9 = scmp.ne.s32.totalorder %s932_s23, 0 }
 0x121   : > { %p940_p11 = scmp.ge.s32.totalorder %s712_s17, 2  ;;  %s345_s22 = scalar_lea.sflag [#allocation4], %s344_s30 }
 0x123   : > { %p485_p2 = pnand %p940_p11, %p939_p9 }
 0x125   : > { %p486_p13 = pneg %p485_p2 }
 0x127   : > { %687 = dma.done.wait (%p486_p13), %s345_s22, 128  }
 0x128   : > { %689 = vsyncadd (%p486_p13), %s345_s22, 4294967168  ;;  %s20_s17 = sadd.s32 1, %s712_s17   ;;  %s941_s12 = smov %s696_s13 }
 0x129   : > { %p17_p0 = scmp.ge.s32.totalorder %s20_s17, 4   ;;  %s942_s13 = smov %s700_s14 }
 0x12a   : > { %s943_s14 = smov %s846_s29  ;;  %s944_s15 = smov %s708_s16 }
 0x12b   : > { %s945_s16 = smov %s947_s11  ;;  %19 = sbr.rel (!%p17_p0) target bundleno = 7 (0x7), region = 86 }
 0x130   :  { %350 = vsyncpa [#allocation3], 1 }
 0x131   :  { %352 = vsyncpa [#allocation3 + $0x1], 1 }
 0x132   :  { %353 = vsyncpa [#allocation6], 1 }
 0x133   :  { %354 = vsyncpa [#allocation4], 1 }
 0x134   :  { %356 = vsyncpa [#allocation4 + $0x1], 1 }

</bundles_post_ra>
